<compile_context>
chip_gen: v7x
topology: tpu7x:2x2x1
jax: 0.10.0
libtpu: 0.0.40
codegen_flags: <defaults>
</compile_context>

<pallas_src>
import math
import functools
from typing import Any, NamedTuple, Optional

import jax
import jax.numpy as jnp
from jax import lax
from jax.experimental import pallas as pl
from jax.experimental.pallas import tpu as pltpu

_SQRT_HALF = 1.0 / math.sqrt(2.0)
_TANH_C = math.sqrt(2.0 / math.pi)


def _round_up(x, m):
    return (x + m - 1) // m * m


def _cdiv(a, b):
    return -(-a // b)


# ---------------------------------------------------------------------------
# chip / VMEM heuristics
# ---------------------------------------------------------------------------
def _chip_config():
    kind = ""
    try:
        kind = (jax.devices()[0].device_kind or "").lower()
    except Exception:
        pass
    if "v7" in kind:   # 2 TCs/chip, 64 MiB VMEM per TC, 256x256 MXU
        return dict(phys_vmem=64 << 20, mxu=256, two_cores=True,
                    tm_streamed=512, tm_resident=256)
    if "v6" in kind:   # 128 MiB VMEM, 256x256 MXU, ridge ~680 flop/byte
        return dict(phys_vmem=128 << 20, mxu=256, two_cores=False,
                    tm_streamed=1024, tm_resident=512)
    if "v5" in kind:   # 128 MiB VMEM, 128x128 MXU, ridge ~240 flop/byte
        return dict(phys_vmem=128 << 20, mxu=128, two_cores=False,
                    tm_streamed=512, tm_resident=512)
    # unknown / v4: conservative defaults
    return dict(phys_vmem=64 << 20, mxu=128, two_cores=True,
                tm_streamed=512, tm_resident=256)


def _pad_dim(d, mxu):
    """Pad a lane dim to 128; prefer 256 on 256x256-MXU chips when padding anyway."""
    if d % 128 == 0:
        return d
    unit = 256 if (mxu >= 256 and d > 128) else 128
    return _round_up(d, unit)


def _maybe_pad(a, target_shape):
    pads = tuple((0, t - s) for s, t in zip(a.shape, target_shape))
    if any(p[1] for p in pads):
        a = jnp.pad(a, pads)
    return a


# ---------------------------------------------------------------------------
# kernels
# ---------------------------------------------------------------------------
def _gelu_f32(h, approx):
    if approx:
        # tanh approximation (EUP op in an otherwise-free slot); flag-gated
        # because torch's default GELU is the erf formulation.
        return 0.5 * h * (1.0 + jnp.tanh(_TANH_C * (h + 0.044715 * h * h * h)))
    return 0.5 * h * (1.0 + lax.erf(h * _SQRT_HALF))


def _mlp_resident_kernel(x_ref, w1_ref, b1_ref, w2_ref, b2_ref, o_ref, *,
                         approx_gelu):
    """Whole MLP for one row tile; weights are VMEM-resident (constant index_map)."""
    x = x_ref[...].astype(w1_ref.dtype)
    h = jnp.dot(x, w1_ref[...], preferred_element_type=jnp.float32)
    h = h + b1_ref[...].astype(jnp.float32)
    h = _gelu_f32(h, approx_gelu)
    out = jnp.dot(h.astype(w2_ref.dtype), w2_ref[...],
                  preferred_element_type=jnp.float32)
    o_ref[...] = (out + b2_ref[...].astype(jnp.float32)).astype(o_ref.dtype)


def _mlp_streamed_kernel(x_ref, w1_ref, b1_ref, w2_ref, b2_ref, o_ref, acc_ref,
                         *, approx_gelu):
    """One (row tile, hidden slab) step; f32 accumulator resident over the H axis."""
    k = pl.program_id(1)

    @pl.when(k == 0)
    def _init():
        acc_ref[...] = jnp.zeros_like(acc_ref)

    x = x_ref[...].astype(w1_ref.dtype)
    h = jnp.dot(x, w1_ref[...], preferred_element_type=jnp.float32)
    h = h + b1_ref[...].astype(jnp.float32)
    h = _gelu_f32(h, approx_gelu)
    acc_ref[...] += jnp.dot(h.astype(w2_ref.dtype), w2_ref[...],
                            preferred_element_type=jnp.float32)

    @pl.when(k == pl.num_programs(1) - 1)
    def _finalize():
        o_ref[...] = (acc_ref[...] + b2_ref[...].astype(jnp.float32)
                      ).astype(o_ref.dtype)
        # dropout with p = 0.0 is the identity -> nothing to do


# ---------------------------------------------------------------------------
# planning + wrapper
# ---------------------------------------------------------------------------
class _Plan(NamedTuple):
    mode: str
    C: int
    H: int
    O: int
    C_pad: int
    H_pad: int
    O_pad: int
    th: int
    tile_m: int
    compute_dtype: Any
    out_dtype: Any
    approx_gelu: bool
    vmem_cap: int
    two_cores: bool


def _vmem_estimate(tm, plan, x_dtype, out_dtype):
    xi = jnp.dtype(x_dtype).itemsize
    wi = jnp.dtype(plan.compute_dtype).itemsize
    oi = jnp.dtype(out_dtype).itemsize
    C_pad, H_pad, O_pad, th = plan.C_pad, plan.H_pad, plan.O_pad, plan.th
    if plan.mode == "resident":
        est = (2 * tm * C_pad * xi                      # x tile (double-buffered)
               + 2 * tm * O_pad * oi                    # out tile
               + 2 * (C_pad * H_pad + H_pad * O_pad) * wi   # weights (assume 2 bufs)
               + 4 * (H_pad + O_pad) * 4                # biases (f32)
               + tm * H_pad * (4 + wi)                  # f32 h + cast for 2nd matmul
               + tm * C_pad * wi                        # x cast
               + tm * O_pad * 4)                        # f32 out temp
    else:
        est = (2 * tm * C_pad * xi
               + 2 * (C_pad * th + th * O_pad) * wi     # streamed weight slabs
               + 2 * tm * O_pad * oi
               + 4 * (th + O_pad) * 4
               + tm * O_pad * 4                         # acc scratch
               + tm * th * (4 + wi)                     # f32 h + cast
               + tm * C_pad * wi
               + tm * O_pad * 4)
    return int(est)


def _mlp_apply(x, w1p, b1p, w2p, b2p, *, plan):
    orig_shape = x.shape
    C, O = plan.C, plan.O
    M = math.prod(orig_shape[:-1]) if len(orig_shape) > 1 else 1
    out_dtype = plan.out_dtype if plan.out_dtype is not None else x.dtype

    # ---- row tile selection (static per input shape) -----------------------
    tm = min(_round_up(plan.tile_m, 8), _round_up(M, 8))
    if plan.two_cores and _cdiv(M, tm) < 2 and M > 8:
        tm = max(8, _round_up(_cdiv(M, 2), 8))          # keep both TCs busy
    while tm > 8 and _vmem_estimate(tm, plan, x.dtype, out_dtype) > plan.vmem_cap:
        tm = max(8, _round_up(tm // 2, 8))
    M_pad = _round_up(M, tm)

    x2d = x.reshape(M, C)
    if M_pad != M or plan.C_pad != C:                   # skip pad when aligned
        x2d = jnp.pad(x2d, ((0, M_pad - M), (0, plan.C_pad - C)))

    vmem_bytes = int(min(plan.vmem_cap,
                         max(2 * _vmem_estimate(tm, plan, x.dtype, out_dtype),
                             16 << 20)))

    if plan.mode == "resident":
        out2d = pl.pallas_call(
            functools.partial(_mlp_resident_kernel, approx_gelu=plan.approx_gelu),
            out_shape=jax.ShapeDtypeStruct((M_pad, plan.O_pad), out_dtype),
            grid_spec=pltpu.PrefetchScalarGridSpec(
                num_scalar_prefetch=0,
                grid=(M_pad // tm,),
                in_specs=[
                    pl.BlockSpec((tm, plan.C_pad), lambda i: (i, 0)),       # x rows
                    pl.BlockSpec((plan.C_pad, plan.H_pad), lambda i: (0, 0)),  # W1
                    pl.BlockSpec((1, plan.H_pad), lambda i: (0, 0)),         # b1
                    pl.BlockSpec((plan.H_pad, plan.O_pad), lambda i: (0, 0)),  # W2
                    pl.BlockSpec((1, plan.O_pad), lambda i: (0, 0)),         # b2
                ],
                out_specs=pl.BlockSpec((tm, plan.O_pad), lambda i: (i, 0)),
            ),
            compiler_params=pltpu.CompilerParams(
                dimension_semantics=("parallel",),
                vmem_limit_bytes=vmem_bytes),
        )(x2d, w1p, b1p, w2p, b2p)
    else:
        out2d = pl.pallas_call(
            functools.partial(_mlp_streamed_kernel, approx_gelu=plan.approx_gelu),
            out_shape=jax.ShapeDtypeStruct((M_pad, plan.O_pad), out_dtype),
            grid_spec=pltpu.PrefetchScalarGridSpec(
                num_scalar_prefetch=0,
                grid=(M_pad // tm, plan.H_pad // plan.th),
                in_specs=[
                    pl.BlockSpec((tm, plan.C_pad), lambda i, k: (i, 0)),     # x rows
                    pl.BlockSpec((plan.C_pad, plan.th), lambda i, k: (0, k)),  # W1 slab
                    pl.BlockSpec((1, plan.th), lambda i, k: (0, k)),          # b1 slice
                    pl.BlockSpec((plan.th, plan.O_pad), lambda i, k: (k, 0)),  # W2 slab
                    pl.BlockSpec((1, plan.O_pad), lambda i, k: (0, 0)),        # b2
                ],
                out_specs=pl.BlockSpec((tm, plan.O_pad), lambda i, k: (i, 0)),
                scratch_shapes=[pltpu.VMEM((tm, plan.O_pad), jnp.float32)],
            ),
            compiler_params=pltpu.CompilerParams(
                dimension_semantics=("parallel", "arbitrary"),
                vmem_limit_bytes=vmem_bytes),
        )(x2d, w1p, b1p, w2p, b2p)

    if M_pad != M or plan.O_pad != O:                    # skip slice when aligned
        out2d = out2d[:M, :O]
    return out2d.reshape(orig_shape[:-1] + (O,))


class PallasMlp:
    """Pallas-TPU forward of the PyTorch `Mlp`: fc2(GELU(fc1(x))), dropout p=0.

    Weights are expected as (in_features, out_features) so the kernel computes
    x @ W (== x @ W_torch.T).  They are cast + padded ONCE at construction.
    """

    def __init__(self, w1, b1, w2, b2, *, compute_dtype=jnp.bfloat16,
                 out_dtype: Optional[Any] = None, tile_m: Optional[int] = None,
                 tile_h: int = 512, mode: str = "auto", approx_gelu: bool = False):
        C, H = w1.shape
        H2, O = w2.shape
        assert H == H2 and b1.shape == (H,) and b2.shape == (O,)

        cfg = _chip_config()
        vmem_cap = int(cfg["phys_vmem"] * 0.8)           # headroom for Mosaic scratch
        mxu = cfg["mxu"]
        w_isz = jnp.dtype(compute_dtype).itemsize

        C_pad = _pad_dim(C, mxu)
        O_pad = _pad_dim(O, mxu)
        H_pad = _pad_dim(H, mxu)

        # resident iff both (double-buffered) weight slabs use well under half
        # of the per-chip VMEM budget.
        weight_bytes = 2 * (C_pad * H_pad + H_pad * O_pad) * w_isz
        if mode == "auto":
            mode = "resident" if weight_bytes <= int(0.45 * vmem_cap) else "streamed"

        th = H_pad
        if mode == "streamed":
            # balanced hidden split (no "while th -= 128" collapse for awkward H)
            unit = 256 if (mxu >= 256 and H > 256) else 128
            tile_h_eff = max(unit, (tile_h // unit) * unit)
            nunits = _cdiv(H, unit)
            ntiles = max(1, _cdiv(nunits * unit, tile_h_eff))
            th = unit * _cdiv(nunits, ntiles)
            H_pad = th * ntiles

        if tile_m is None:
            tile_m = cfg["tm_resident"] if mode == "resident" else cfg["tm_streamed"]

        self.plan = _Plan(mode=mode, C=C, H=H, O=O, C_pad=C_pad, H_pad=H_pad,
                          O_pad=O_pad, th=th, tile_m=int(tile_m),
                          compute_dtype=compute_dtype, out_dtype=out_dtype,
                          approx_gelu=bool(approx_gelu), vmem_cap=vmem_cap,
                          two_cores=bool(cfg["two_cores"]))

        # ---- weights cast + padded ONCE (hoisted out of the forward path) ---
        self.w1p = _maybe_pad(w1.astype(compute_dtype), (C_pad, H_pad))
        self.b1p = _maybe_pad(b1.astype(jnp.float32), (H_pad,)).reshape(1, H_pad)
        self.w2p = _maybe_pad(w2.astype(compute_dtype), (H_pad, O_pad))
        self.b2p = _maybe_pad(b2.astype(jnp.float32), (O_pad,)).reshape(1, O_pad)

        self._fwd = jax.jit(functools.partial(_mlp_apply, plan=self.plan))

    def __call__(self, x):
        return self._fwd(x, self.w1p, self.b1p, self.w2p, self.b2p)


# ---------------------------------------------------------------------------
# reference + test harness
# ---------------------------------------------------------------------------
def _init_linear(key, fan_in, fan_out, dtype=jnp.float32):
    """Deterministic init mimicking nn.Linear's U(-1/sqrt(fan_in), +...)."""
    kw, kb = jax.random.split(key)
    bound = 1.0 / math.sqrt(fan_in)
    # stored as (in, out) so the kernel computes x @ W (== x @ W_torch.T)
    w = jax.random.uniform(kw, (fan_in, fan_out), dtype, -bound, bound)
    b = jax.random.uniform(kb, (fan_out,), dtype, -bound, bound)
    return w, b


def reference_mlp(x, w1, b1, w2, b2):
    h = x @ w1 + b1
    h = 0.5 * h * (1.0 + lax.erf(h / math.sqrt(2.0)))
    return h @ w2 + b2


if __name__ == "__main__":
    key = jax.random.PRNGKey(0)
    k_x, k_fc1, k_fc2 = jax.random.split(key, 3)

    # Small shapes consistent with the transformer MLP:
    #   batch=2, tokens=8, in_features=32, hidden_features=128, out=32
    B, N, C, H = 2, 8, 32, 128
    x = jax.random.normal(k_x, (B, N, C), jnp.float32)
    w1, b1 = _init_linear(k_fc1, C, H)
    w2, b2 = _init_linear(k_fc2, H, C)

    ref = reference_mlp(x.reshape(-1, C), w1, b1, w2, b2).reshape(B, N, C)

    # f32 MXU path (weights VMEM-resident) -> exact parity with erf-GELU ref.
    mlp_f32 = PallasMlp(w1, b1, w2, b2, compute_dtype=jnp.float32)
    out_f32 = jax.block_until_ready(mlp_f32(x))
    assert out_f32.shape == (B, N, C)
    assert jnp.allclose(out_f32, ref, atol=1e-5, rtol=1e-5)

    # Default bf16-input / f32-accumulate path (MXU peak on v6e/v7x).
    mlp_bf16 = PallasMlp(w1, b1, w2, b2)
    out_bf16 = jax.block_until_ready(mlp_bf16(x))
    assert out_bf16.shape == (B, N, C)
    assert jnp.allclose(out_bf16, ref, atol=3e-2, rtol=3e-2)

    # Exercise the streamed-H accumulation path (K grid axis > 1) plus ragged
    # M / non-128-aligned C handling (zero padding + trailing slice).
    B2, N2, C2, H2 = 3, 7, 48, 1024
    x2 = jax.random.normal(k_x, (B2, N2, C2), jnp.float32)
    w1b, b1b = _init_linear(k_fc1, C2, H2)
    w2b, b2b = _init_linear(k_fc2, H2, C2)
    ref2 = reference_mlp(x2.reshape(-1, C2), w1b, b1b, w2b, b2b).reshape(B2, N2, C2)
    mlp_streamed = PallasMlp(w1b, b1b, w2b, b2b, compute_dtype=jnp.float32,
                             mode="streamed", tile_m=64, tile_h=256)
    out2 = jax.block_until_ready(mlp_streamed(x2))
    assert out2.shape == (B2, N2, C2)
    assert jnp.allclose(out2, ref2, atol=1e-4, rtol=1e-4)

    print("KERNEL_OK")
</pallas_src>

<mosaic_0001>
module attributes {stable_mosaic.version = 11 : i64} {
  func.func @_mlp_resident_kernel(%arg0: i32, %arg1: memref<8x128xf32, #tpu.memory_space<vmem>>, %arg2: memref<128x128xf32, #tpu.memory_space<vmem>>, %arg3: memref<1x128xf32, #tpu.memory_space<vmem>>, %arg4: memref<128x128xf32, #tpu.memory_space<vmem>>, %arg5: memref<1x128xf32, #tpu.memory_space<vmem>>, %arg6: memref<8x128xf32, #tpu.memory_space<vmem>>) attributes {dimension_semantics = [#tpu.dimension_semantics<parallel>], iteration_bounds = array<i64: 2>, scalar_prefetch = 0 : i64, scratch_operands = 0 : i64, tpu.core_type = #tpu.core_type<tc>, window_params = [{transform_indices = @transform_0, window_bounds = array<i64: 8, 128>}, {pipeline_mode = #tpu.pipeline_mode<synchronous>, transform_indices = @transform_1, window_bounds = array<i64: 128, 128>}, {pipeline_mode = #tpu.pipeline_mode<synchronous>, transform_indices = @transform_2, window_bounds = array<i64: 1, 128>}, {pipeline_mode = #tpu.pipeline_mode<synchronous>, transform_indices = @transform_3, window_bounds = array<i64: 128, 128>}, {pipeline_mode = #tpu.pipeline_mode<synchronous>, transform_indices = @transform_4, window_bounds = array<i64: 1, 128>}, {transform_indices = @transform_5, window_bounds = array<i64: 8, 128>}]} {
    %c0 = arith.constant 0 : index
    %c0_0 = arith.constant 0 : index
    %0 = vector.load %arg1[%c0, %c0_0] : memref<8x128xf32, #tpu.memory_space<vmem>>, vector<8x128xf32>
    %c0_1 = arith.constant 0 : index
    %c0_2 = arith.constant 0 : index
    %1 = vector.load %arg2[%c0_1, %c0_2] : memref<128x128xf32, #tpu.memory_space<vmem>>, vector<128x128xf32>
    %cst = arith.constant dense<0.000000e+00> : vector<8x128xf32>
    %2 = tpu.matmul %0, %1, %cst {dimension_numbers = #tpu.dot_dimension_numbers<[1], [0], [0], [1], [0, 0, 1, 1], [], []>} : vector<8x128xf32>, vector<128x128xf32>, vector<8x128xf32> -> vector<8x128xf32>
    %c0_3 = arith.constant 0 : index
    %c0_4 = arith.constant 0 : index
    %3 = vector.load %arg3[%c0_3, %c0_4] : memref<1x128xf32, #tpu.memory_space<vmem>>, vector<1x128xf32>
    %4 = vector.broadcast %3 : vector<1x128xf32> to vector<8x128xf32>
    %5 = arith.addf %2, %4 : vector<8x128xf32>
    %cst_5 = arith.constant 5.000000e-01 : f32
    %6 = vector.broadcast %cst_5 : f32 to vector<8x128xf32>
    %7 = arith.mulf %6, %5 : vector<8x128xf32>
    %cst_6 = arith.constant 0.707106769 : f32
    %8 = vector.broadcast %cst_6 : f32 to vector<8x128xf32>
    %9 = arith.mulf %5, %8 : vector<8x128xf32>
    %10 = math.erf %9 : vector<8x128xf32>
    %cst_7 = arith.constant 1.000000e+00 : f32
    %11 = vector.broadcast %cst_7 : f32 to vector<8x128xf32>
    %12 = arith.addf %11, %10 : vector<8x128xf32>
    %13 = arith.mulf %7, %12 : vector<8x128xf32>
    %c0_8 = arith.constant 0 : index
    %c0_9 = arith.constant 0 : index
    %14 = vector.load %arg4[%c0_8, %c0_9] : memref<128x128xf32, #tpu.memory_space<vmem>>, vector<128x128xf32>
    %cst_10 = arith.constant dense<0.000000e+00> : vector<8x128xf32>
    %15 = tpu.matmul %13, %14, %cst_10 {dimension_numbers = #tpu.dot_dimension_numbers<[1], [0], [0], [1], [0, 0, 1, 1], [], []>} : vector<8x128xf32>, vector<128x128xf32>, vector<8x128xf32> -> vector<8x128xf32>
    %c0_11 = arith.constant 0 : index
    %c0_12 = arith.constant 0 : index
    %16 = vector.load %arg5[%c0_11, %c0_12] : memref<1x128xf32, #tpu.memory_space<vmem>>, vector<1x128xf32>
    %17 = vector.broadcast %16 : vector<1x128xf32> to vector<8x128xf32>
    %18 = arith.addf %15, %17 : vector<8x128xf32>
    %c0_13 = arith.constant 0 : index
    %c0_14 = arith.constant 0 : index
    %19 = vector.load %arg6[%c0_13, %c0_14] : memref<8x128xf32, #tpu.memory_space<vmem>>, vector<8x128xf32>
    tpu.vector_store %arg6[%c0_13, %c0_14], %18 {strides = array<i32>} : memref<8x128xf32, #tpu.memory_space<vmem>>, vector<8x128xf32>,
    return
  }
  func.func @transform_0(%arg0: i32) -> (i32, i32) {
    %c0_i32 = arith.constant 0 : i32
    %c0_i32_0 = arith.constant 0 : i32
    return %arg0, %c0_i32 : i32, i32
  }
  func.func @transform_1(%arg0: i32) -> (i32, i32) {
    %c0_i32 = arith.constant 0 : i32
    %c0_i32_0 = arith.constant 0 : i32
    %c0_i32_1 = arith.constant 0 : i32
    return %c0_i32, %c0_i32_0 : i32, i32
  }
  func.func @transform_2(%arg0: i32) -> (i32, i32) {
    %c0_i32 = arith.constant 0 : i32
    %c0_i32_0 = arith.constant 0 : i32
    %c0_i32_1 = arith.constant 0 : i32
    return %c0_i32, %c0_i32_0 : i32, i32
  }
  func.func @transform_3(%arg0: i32) -> (i32, i32) {
    %c0_i32 = arith.constant 0 : i32
    %c0_i32_0 = arith.constant 0 : i32
    %c0_i32_1 = arith.constant 0 : i32
    return %c0_i32, %c0_i32_0 : i32, i32
  }
  func.func @transform_4(%arg0: i32) -> (i32, i32) {
    %c0_i32 = arith.constant 0 : i32
    %c0_i32_0 = arith.constant 0 : i32
    %c0_i32_1 = arith.constant 0 : i32
    return %c0_i32, %c0_i32_0 : i32, i32
  }
  func.func @transform_5(%arg0: i32) -> (i32, i32) {
    %c0_i32 = arith.constant 0 : i32
    %c0_i32_0 = arith.constant 0 : i32
    return %arg0, %c0_i32 : i32, i32
  }
}

</mosaic_0001>

<bundles_post_ra>
// kernel: _mlp_apply.1
= control target key start
LH: loop header
LB: loop body
LE: loop exit
PB: predicated region body
PF: predicated region fallthrough
CT: control target
= control target key end

     0   :  { %10 = vsyncpa [#allocation3], 0  ;;  %s952_s0 = inlined_call_operand.vmem [shape: f32[16,128], index: 0, kind: input, shape index: {}]   ;;  %s953_s1 = inlined_call_operand.hbm [shape: f32[128,128], index: 1, kind: input, shape index: {}]   ;;  %s954_s2 = inlined_call_operand.vmem [shape: f32[1,128], index: 2, kind: input, shape index: {}]   ;;  %s955_s3 = inlined_call_operand.hbm [shape: f32[128,128], index: 3, kind: input, shape index: {}]   ;;  %s956_s4 = inlined_call_operand.vmem [shape: f32[1,128], index: 4, kind: input, shape index: {}]   ;;  %s957_s5 = inlined_call_operand.vmem [shape: f32[16,128], index: 5, kind: output, shape index: {}]  }
   0x1   :  { %11 = vsyncpa [#allocation5], 0  ;;  %s830_s18 = smov 0  }
   0x2 LB: > { %s836_s19 = sadd.s32 4294967295, %s791_s18   ;;  %p520_p0 = scmp.ge.s32.totalorder %s791_s18, 1  ;;  %s791_s18 = sphi %s830_s18, %s17_s18  }
   0x3   : > { %p158_p1 = scmp.lt.s32.totalorder %s791_s18, 3  ;;  %s793_s20 = smov [#allocation2]  }
   0x4   : > { %s170_s21 = sshll.u32 %s793_s20, 4  ;;  %p958_p3 = scmp.eq.s32.totalorder %s836_s19, 0  ;;  %s171_s21 = int_to_ptr.vmem [resolvable:$true] %s170_s21 }
   0x5   : > { %p840_p2 = pnand %p520_p0, %p158_p1  ;;  %s794_s23 = smov [#allocation4]  }
   0x6   : > { %s186_s24 = sshll.u32 %s794_s23, 4  ;;  %s721_s28 = scalar_lea.hbm %s953_s1, 2048  ;;  %s853_s24 = int_to_ptr.vmem [resolvable:$true] %s186_s24 }
   0x7   : > { %s960_s22 = scalar_select %p840_p2, 1, 0 }
   0x8   : > { %p693_p4 = pneg %p840_p2  ;;  %p722_p6 = scmp.ne.s32.totalorder %s953_s1, %s721_s28 }
   0x9   : > { %p728_p10 = scmp.lt.u32.totalorder %s721_s28, %s953_s1 }
   0xa   : > { %p849_p5 = pnand %p958_p3, %p693_p4 }
   0xc   : > { %p723_p7 = pneg %p849_p5 }
   0xe   : > { %p724_p8 = pnand %p723_p7, %p722_p6 }
  0x10   : > { %p725_p9 = pneg %p724_p8 }
  0x12   : > { %p730_p11 = pnand %p728_p10, %p725_p9 }
  0x14   : > { %733 = shalt.err (!%p730_p11)
}
  0x15   : > { %s734_s8 = scalar_lea.vmem %s171_s21, 2048  ;;  %p742_p1 = scmp.lt.s32.totalorder %s171_s21, %s171_s21 }
  0x16   : > { %p735_p12 = scmp.ne.s32.totalorder %s171_s21, %s734_s8  ;;  %p743_p4 = scmp.lt.s32.totalorder %s734_s8, %s734_s8 }
  0x18   : > { %p737_p13 = pnand %p735_p12, %p723_p7  ;;  %p744_p3 = por %p743_p4, %p742_p1 }
  0x1a   : > { %p738_p0 = pneg %p737_p13 }
  0x1c   : > { %p745_p2 = pnand %p744_p3, %p738_p0 }
  0x1e   : > { %748 = shalt.err (!%p745_p2)
}
  0x1f   : > { %s795_s9 = smov 128   ;;  %s796_s10 = smov 8  }
  0x20   : > { %696 = dma.hbm_to_vmem [thread:$0]  (!%p849_p5), %s953_s1, 2048, %s171_s21, [#allocation3], %s795_s9, %s795_s9, %s796_s10  }
  0x21   : > { %s749_s15 = scalar_lea.hbm %s955_s3, 2048 }
  0x22   : > { %p750_p6 = scmp.ne.s32.totalorder %s955_s3, %s749_s15  ;;  %p756_p8 = scmp.lt.u32.totalorder %s749_s15, %s955_s3 }
  0x24   : > { %p752_p2 = pnand %p750_p6, %p723_p7 }
  0x26   : > { %p753_p3 = pneg %p752_p2 }
  0x28   : > { %p758_p9 = pnand %p756_p8, %p753_p3 }
  0x2a   : > { %761 = shalt.err (!%p758_p9)
}
  0x2b   : > { %s762_s21 = scalar_lea.vmem %s853_s24, 2048  ;;  %p770_p13 = scmp.lt.s32.totalorder %s853_s24, %s853_s24 }
  0x2c   : > { %p763_p10 = scmp.ne.s32.totalorder %s853_s24, %s762_s21  ;;  %p771_p0 = scmp.lt.s32.totalorder %s762_s21, %s762_s21 }
  0x2e   : > { %p765_p11 = pnand %p763_p10, %p723_p7  ;;  %p772_p1 = por %p771_p0, %p770_p13 }
  0x30   : > { %p766_p12 = pneg %p765_p11 }
  0x32   : > { %p773_p4 = pnand %p772_p1, %p766_p12 }
  0x34   : > { %776 = shalt.err (!%p773_p4)
}
  0x35   : > { %699 = dma.hbm_to_vmem [thread:$0]  (!%p849_p5), %s955_s3, 2048, %s853_s24, [#allocation5], %s795_s9, %s795_s9, %s796_s10  }
  0x36   : > { %p962_p6 = scmp.ne.s32.totalorder %s960_s22, 0 }
  0x37   : > { %p963_p2 = scmp.eq.s32.totalorder (!%p962_p6), %s836_s19, 0 }
  0x38   : > { %212 = sbr.rel (%p962_p6) target bundleno = 547 (0x223), region = 40 }
  0x3f   : > { %782 = dma.done.wait (%p963_p2), [#allocation3], 2048   ;;  %p964_p7 = pmov %p963_p2 }
  0x40   : > { %p965_p3 = pmov %p963_p2 }
  0x41   : > { %784 = vsyncadd (%p964_p7), [#allocation3], 4294965248 }
  0x42   : > { %786 = dma.done.wait (%p965_p3), [#allocation5], 2048   ;;  %p966_p8 = pmov %p963_p2 }
  0x43   : > { %v797_v0 = vmov 0.0|0.0   ;;  %vm798_vm0 = vmmov 0   ;;  %v799_v1 = vmov 0.0   ;;  %v251_v2 = vld [vmem:[#allocation2] sm:$0xff]  ;;  %v252_v3 = vld [vmem:[#allocation2 + $0x8] sm:$0xff]  ;;  %v253_v4 = vld [vmem:[#allocation2 + $0x10] sm:$0xff] }
  0x44   : > { %788 = vsyncadd (%p966_p8), [#allocation5], 4294965248  ;;  %637 = vmatprep.subr.bf16.mxu0 %v797_v0  ;;  %599 = vmatprep.mubr.msk.f32.mxu0 %vm798_vm0, %v799_v1  ;;  %v638_v5 = vpack.c.bf16 %v252_v3, %v251_v2  ;;  %v254_v6 = vld [vmem:[#allocation2 + $0x18] sm:$0xff]  ;;  %v255_v8 = vld [vmem:[#allocation2 + $0x20] sm:$0xff]  ;;  %p242_p5 = scmp.lt.s32.totalorder %s836_s19, 1 }
  0x45   : > { %661 = vmatprep.subr.bf16.mxu1 %v797_v0  ;;  %634 = vmatprep.mubr.msk.f32.mxu1 %vm798_vm0, %v799_v1  ;;  %v641_v7 = vpack.c.bf16 %v254_v6, %v253_v4  ;;  %v256_v9 = vld [vmem:[#allocation2 + $0x28] sm:$0xff]  ;;  %v349_v10 = vld [vmem:[#allocation4] sm:$0xff]  ;;  %v351_v12 = vld [vmem:[#allocation4 + $0x10] sm:$0xff] }
  0x46   : > { %639 = vmatpush3.bf16.msra.mxu0 %v638_v5  ;;  %v350_v11 = vld [vmem:[#allocation4 + $0x8] sm:$0xff]  ;;  %v352_v13 = vld [vmem:[#allocation4 + $0x18] sm:$0xff]  ;;  %v644_v14 = vpack.c.bf16 %v256_v9, %v255_v8  ;;  %v257_v16 = vld [vmem:[#allocation2 + $0x30] sm:$0xff]  ;;  %s968_s19 = smov (!%p242_p5, %s836_s19), 1 }
  0x47   : > { %640 = vmatprep.subr.bf16.mxu0 %v797_v0  ;;  %v662_v15 = vpack.c.bf16 %v350_v11, %v349_v10  ;;  %v258_v17 = vld [vmem:[#allocation2 + $0x38] sm:$0xff]  ;;  %v665_v18 = vpack.c.bf16 %v352_v13, %v351_v12  ;;  %v353_v19 = vld [vmem:[#allocation4 + $0x20] sm:$0xff]  ;;  %v354_v20 = vld [vmem:[#allocation4 + $0x28] sm:$0xff]  ;;  %s527_s22 = sshll.u32 %s968_s19, 3 }
  0x48   : > { %v647_v21 = vpack.c.bf16 %v258_v17, %v257_v16  ;;  %v259_v22 = vld [vmem:[#allocation2 + $0x40] sm:$0xff]  ;;  %v260_v23 = vld [vmem:[#allocation2 + $0x48] sm:$0xff]  ;;  %v668_v24 = vpack.c.bf16 %v354_v20, %v353_v19  ;;  %v261_v26 = vld [vmem:[#allocation2 + $0x50] sm:$0xff]  ;;  %s245_s28 = scalar_lea.vmem %s952_s0, %s527_s22  ;;  %s249_s10 = scalar_lea.vmem %s957_s5, %s527_s22 }
  0x49   : > { %663 = vmatpush3.bf16.msra.mxu1 %v662_v15  ;;  %v650_v25 = vpack.c.bf16 %v260_v23, %v259_v22  ;;  %v262_v27 = vld [vmem:[#allocation2 + $0x58] sm:$0xff]  ;;  %v263_v29 = vld [vmem:[#allocation2 + $0x60] sm:$0xff]  ;;  %v264_v30 = vld [vmem:[#allocation2 + $0x68] sm:$0xff] }
  0x4a   : > { %642 = vmatpush3.bf16.msra.mxu0 %v641_v7  ;;  %664 = vmatprep.subr.bf16.mxu1 %v797_v0  ;;  %v653_v28 = vpack.c.bf16 %v262_v27, %v261_v26  ;;  %v656_v31 = vpack.c.bf16 %v264_v30, %v263_v29  ;;  %v265_v32 = vld [vmem:[#allocation2 + $0x70] sm:$0xff]  ;;  %v266_v33 = vld [vmem:[#allocation2 + $0x78] sm:$0xff]  ;;  %v250_v35 = vld [vmem:[%s245_s28] sm:$0xff] }
  0x4b   : > { %643 = vmatprep.subr.bf16.mxu0 %v797_v0  ;;  %v659_v34 = vpack.c.bf16 %v266_v33, %v265_v32  ;;  %v355_v36 = vld [vmem:[#allocation4 + $0x30] sm:$0xff]  ;;  %v356_v37 = vld [vmem:[#allocation4 + $0x38] sm:$0xff]  ;;  %v357_v39 = vld [vmem:[#allocation4 + $0x40] sm:$0xff] }
  0x4c   : > { %v671_v38 = vpack.c.bf16 %v356_v37, %v355_v36  ;;  %v358_v40 = vld [vmem:[#allocation4 + $0x48] sm:$0xff]  ;;  %v359_v42 = vld [vmem:[#allocation4 + $0x50] sm:$0xff]  ;;  %v360_v43 = vld [vmem:[#allocation4 + $0x58] sm:$0xff] }
  0x4d   : > { %666 = vmatpush3.bf16.msra.mxu1 %v665_v18  ;;  %v674_v41 = vpack.c.bf16 %v358_v40, %v357_v39  ;;  %v677_v44 = vpack.c.bf16 %v360_v43, %v359_v42  ;;  %v361_v45 = vld [vmem:[#allocation4 + $0x60] sm:$0xff]  ;;  %v362_v46 = vld [vmem:[#allocation4 + $0x68] sm:$0xff]  ;;  %v363_v48 = vld [vmem:[#allocation4 + $0x70] sm:$0xff] }
  0x4e   : > { %645 = vmatpush3.bf16.msra.mxu0 %v644_v14  ;;  %667 = vmatprep.subr.bf16.mxu1 %v797_v0  ;;  %v680_v47 = vpack.c.bf16 %v362_v46, %v361_v45  ;;  %v364_v49 = vld [vmem:[#allocation4 + $0x78] sm:$0xff]  ;;  %v529_v51 = vld [vmem:[%s954_s2] ss:$0 sm:$0xff] }
  0x4f   : > { %646 = vmatprep.subr.bf16.mxu0 %v797_v0  ;;  %v683_v50 = vpack.c.bf16 %v364_v49, %v363_v48  ;;  %v530_v60 = vld [vmem:[%s956_s4] ss:$0 sm:$0xff] }
  0x51   : > { %669 = vmatpush3.bf16.msra.mxu1 %v668_v24 }
  0x52   : > { %648 = vmatpush3.bf16.msra.mxu0 %v647_v21  ;;  %670 = vmatprep.subr.bf16.mxu1 %v797_v0 }
  0x53   : > { %649 = vmatprep.subr.bf16.mxu0 %v797_v0 }
  0x55   : > { %672 = vmatpush3.bf16.msra.mxu1 %v671_v38 }
  0x56   : > { %651 = vmatpush3.bf16.msra.mxu0 %v650_v25  ;;  %673 = vmatprep.subr.bf16.mxu1 %v797_v0 }
  0x57   : > { %652 = vmatprep.subr.bf16.mxu0 %v797_v0 }
  0x59   : > { %675 = vmatpush3.bf16.msra.mxu1 %v674_v41 }
  0x5a   : > { %654 = vmatpush3.bf16.msra.mxu0 %v653_v28  ;;  %676 = vmatprep.subr.bf16.mxu1 %v797_v0 }
  0x5b   : > { %655 = vmatprep.subr.bf16.mxu0 %v797_v0 }
  0x5d   : > { %678 = vmatpush3.bf16.msra.mxu1 %v677_v44 }
  0x5e   : > { %657 = vmatpush3.bf16.msra.mxu0 %v656_v31  ;;  %679 = vmatprep.subr.bf16.mxu1 %v797_v0 }
  0x5f   : > { %658 = vmatprep.subr.bf16.mxu0 %v797_v0 }
  0x61   : > { %681 = vmatpush3.bf16.msra.mxu1 %v680_v47 }
  0x62   : > { %660 = vmatpush3.bf16.msra.mxu0 %v659_v34  ;;  %682 = vmatprep.subr.bf16.mxu1 %v797_v0 }
  0x65   : > { %600 = vmatmul.mubr.f32.vlgmr.msra.gmra.mrb[0].mxu0 %v250_v35  ;;  %684 = vmatpush3.bf16.msra.mxu1 %v683_v50 }
 0x138   : > { %v340_v52 = vpop.f32.mrb[0].mxu0 }
 0x139   : > { %v341_v53 = vadd.f32 %v529_v51, %v340_v52  ;;  %v601_v54 = vpop.f32.mrb[1].mxu0 }
 0x13b   : > { %v345_v55 = vmul.f32 0.70710677, %v341_v53  ;;  %v344_v57 = vmul.f32 0.5, %v341_v53 }
 0x13d   : > { %719 = verf.f32 %v345_v55 }
 0x147   : > { %v720_v56 = vpop.eup %719 }
 0x148   : > { %v347_v58 = vadd.f32 1.0, %v720_v56 }
 0x14a   : > { %v348_v59 = vmul.f32 %v347_v58, %v344_v57 }
 0x14c   : > { %635 = vmatmul.mubr.f32.vlgmr.msra.gmra.mrb[0].mxu1 %v348_v59 }
 0x21f   : > { %v438_v61 = vpop.f32.mrb[0].mxu1 }
 0x220   : > { %v439_v62 = vadd.f32 %v530_v60, %v438_v61  ;;  %v636_v63 = vpop.f32.mrb[1].mxu1 }
 0x222   : > { %442 = vst [vmem:[%s249_s10] sm:$0xff] %v439_v62 }
 0x223 PF: > { %s17_s18 = sadd.s32 1, %s791_s18  }
 0x224   : > { %p14_p9 = scmp.ge.s32.totalorder %s17_s18, 4  }
 0x226   :  { %16 = sbr.rel (!%p14_p9) target bundleno = 2 (0x2), region = 79 }
 0x22d   :  { %462 = vsyncpa [#allocation3], 1 }
 0x22e   :  { %464 = vsyncpa [#allocation3 + $0x1], 1 }
 0x22f   :  { %465 = vsyncpa [#allocation5], 1 }

</bundles_post_ra>
